<compile_context>
chip_gen: v6e
topology: v6e:2x2x1
jax: 0.10.0
libtpu: 0.0.40
codegen_flags: <defaults>
</compile_context>

<pallas_src>
import functools

import numpy as np
import jax
import jax.numpy as jnp
from jax import lax
from jax.experimental import pallas as pl
from jax.experimental.pallas import tpu as pltpu


def _cdiv(a, b):
    return (a + b - 1) // b


def _round_up(a, b):
    return _cdiv(a, b) * b


def _vmem_capacity_bytes(default=64 * 1024 * 1024):
    """Physical VMEM per TensorCore; conservative (v7x-sized) fallback."""
    try:
        cap = int(pltpu.get_tpu_info().vmem_capacity_bytes)
        if cap > 0:
            return cap
    except Exception:
        pass
    return default


# --------------------------------------------------------------------------
# Kernels
# --------------------------------------------------------------------------
def _gap_kernel_single(x_ref, o_ref, *, inv_hw):
    """Whole H*W axis in one block: reduce and store directly (no scratch)."""
    x = x_ref[...].astype(jnp.float32)
    o_ref[...] = (jnp.sum(x, axis=-1, keepdims=True) * inv_hw).astype(o_ref.dtype)


def _gap_kernel_tiled(x_ref, o_ref, acc_ref, *, hw, tk, inv_hw, mask_cols):
    """H*W axis tiled across the last grid dim; lane-dense f32 accumulator."""
    k = pl.program_id(1)
    last = pl.num_programs(1) - 1
    n_chunks = tk // 128  # tk is a multiple of 128 in this path

    @pl.when(k == 0)
    def _init():
        acc_ref[...] = jnp.zeros_like(acc_ref)

    def _accumulate(x):
        # Plain VPU adds on 128-lane-aligned static slices (vreg aligned, no
        # relayout, no per-step cross-lane reduce, no 1-lane masked stores).
        acc = acc_ref[...]
        for c in range(n_chunks):
            acc = acc + x[:, c * 128:(c + 1) * 128]
        acc_ref[...] = acc

    if mask_cols:
        # Only the last hw block is ragged: pay iota/compare/select there only.
        @pl.when(k == last)
        def _ragged_block():
            col = k * tk + lax.broadcasted_iota(jnp.int32, x_ref.shape, 1)
            _accumulate(jnp.where(col < hw, x_ref[...].astype(jnp.float32), 0.0))

        @pl.when(k != last)
        def _full_block():
            _accumulate(x_ref[...].astype(jnp.float32))
    else:
        _accumulate(x_ref[...].astype(jnp.float32))

    @pl.when(k == last)
    def _finalize():
        row_sum = jnp.sum(acc_ref[...], axis=-1, keepdims=True)  # one XLU reduce
        o_ref[...] = (row_sum * inv_hw).astype(o_ref.dtype)


# --------------------------------------------------------------------------
# Wrapper
# --------------------------------------------------------------------------
def global_avg_pool(x, *, _per_block_budget_bytes=None):
    """Mean over the last two dims of x (PyTorch GlobalAvgPool.forward)."""
    lead = x.shape[:-2]
    H, W = x.shape[-2], x.shape[-1]
    hw = H * W
    n = int(np.prod(lead)) if lead else 1

    # Flatten to (rows, hw); free view for contiguous NCHW.
    x2 = x.reshape(n, hw)

    itemsize = x.dtype.itemsize
    # Row granularity: 8 for f32, 16 for bf16, 32 for int8/fp8 (sublane packing).
    gran = max(8, 32 // itemsize)

    # Per-generation VMEM sizing: ~1/6 of physical per input block so the
    # double-buffered input uses ~1/3 of VMEM on every chip (64 MiB v7x,
    # 128 MiB v5e/v6e).
    vmem_cap = _vmem_capacity_bytes()
    per_block_budget = (_per_block_budget_bytes
                        if _per_block_budget_bytes is not None
                        else vmem_cap // 6)

    # --- choose the hw (lane) tile, accounting for 128-lane padding ---------
    hw_padded = _round_up(hw, 128)
    if gran * hw_padded * itemsize <= per_block_budget:
        tk, kt, mask_cols = hw, 1, False          # whole H*W axis in one block
    else:
        tk = min(_round_up(hw, 128), 8192)        # multiple of 128
        max_tk = max(128, (per_block_budget // (gran * itemsize) // 128) * 128)
        tk = min(tk, max_tk)
        kt = _cdiv(hw, tk)
        mask_cols = (hw % tk) != 0
    tk_padded = _round_up(tk, 128)

    # --- choose the row tile from the (padded) VMEM footprint ---------------
    tr = per_block_budget // (tk_padded * itemsize)
    tr = max(gran, (tr // gran) * gran)
    tr = min(tr, _round_up(n, gran))

    rt = _cdiv(n, tr)
    if n > gran and rt < 2:
        # Give both v7x TensorCores work along the parallel row axis.
        tr = max(gran, _round_up(_cdiv(n, 2), gran))
        rt = _cdiv(n, tr)
    if 2 < rt < 16 and rt % 2 == 1:
        # Prefer an even number of row blocks so the megacore split is balanced.
        cand = max(gran, _round_up(_cdiv(n, rt + 1), gran))
        if _cdiv(n, cand) % 2 == 0:
            tr, rt = cand, _cdiv(n, cand)

    # --- VMEM limit from the actual (padded, double-buffered) footprint -----
    block_bytes = tr * tk_padded * itemsize
    out_block_bytes = tr * 128 * itemsize            # (tr, 1) padded to 128 lanes
    scratch_bytes = tr * 128 * 4 if kt > 1 else 0
    vmem_limit_bytes = int(min(
        vmem_cap,
        max(32 * 1024 * 1024,
            2 * block_bytes + 2 * out_block_bytes + scratch_bytes + (8 << 20)),
    ))

    inv_hw = 1.0 / hw

    if kt == 1:
        kernel = functools.partial(_gap_kernel_single, inv_hw=inv_hw)
        grid = (rt,)
        in_specs = [pl.BlockSpec((tr, tk), lambda i: (i, 0))]
        out_specs = pl.BlockSpec((tr, 1), lambda i: (i, 0))
        scratch_shapes = []
        dim_sem = ("parallel",)
    else:
        kernel = functools.partial(
            _gap_kernel_tiled, hw=hw, tk=tk, inv_hw=inv_hw, mask_cols=mask_cols)
        grid = (rt, kt)
        in_specs = [pl.BlockSpec((tr, tk), lambda i, k: (i, k))]
        out_specs = pl.BlockSpec((tr, 1), lambda i, k: (i, 0))
        scratch_shapes = [pltpu.VMEM((tr, 128), jnp.float32)]
        dim_sem = ("parallel", "arbitrary")

    out2 = pl.pallas_call(
        kernel,
        out_shape=jax.ShapeDtypeStruct((n, 1), x.dtype),
        grid=grid,
        in_specs=in_specs,
        out_specs=out_specs,
        scratch_shapes=scratch_shapes,
        compiler_params=pltpu.CompilerParams(
            dimension_semantics=dim_sem,
            vmem_limit_bytes=vmem_limit_bytes,
        ),
        cost_estimate=pl.CostEstimate(
            flops=n * hw,
            transcendentals=0,
            bytes_accessed=n * hw * itemsize + n * itemsize,
        ),
    )(x2)

    return out2[:, 0].reshape(lead)


if __name__ == "__main__":
    key = jax.random.PRNGKey(0)

    # 1) Small NCHW input consistent with the module's forward (kt == 1 path).
    x = jax.random.normal(key, (2, 4, 16, 16), dtype=jnp.float32)
    y = global_avg_pool(x)
    jax.block_until_ready(y)
    y_ref = x.reshape(*x.shape[:-2], -1).mean(-1)
    np.testing.assert_allclose(np.asarray(y), np.asarray(y_ref),
                               rtol=1e-6, atol=1e-6)
    assert y.shape == (2, 4)

    # 2) Ragged row count (not a multiple of 8) and odd spatial size.
    x2 = jax.random.normal(jax.random.PRNGKey(1), (3, 5, 7, 9),
                           dtype=jnp.float32)
    y2 = global_avg_pool(x2)
    jax.block_until_ready(y2)
    y2_ref = x2.reshape(*x2.shape[:-2], -1).mean(-1)
    np.testing.assert_allclose(np.asarray(y2), np.asarray(y2_ref),
                               rtol=1e-5, atol=1e-5)
    assert y2.shape == (3, 5)

    # 3) Force the hw-tiled (kt > 1) path with a tiny per-block budget so the
    #    lane-dense accumulator + ragged last hw block are exercised at small
    #    shapes (hw=576, tk=256, kt=3, last block masked).
    x3 = jax.random.normal(jax.random.PRNGKey(2), (2, 3, 24, 24),
                           dtype=jnp.float32)
    y3 = global_avg_pool(x3, _per_block_budget_bytes=8 * 1024)
    jax.block_until_ready(y3)
    y3_ref = x3.reshape(*x3.shape[:-2], -1).mean(-1)
    np.testing.assert_allclose(np.asarray(y3), np.asarray(y3_ref),
                               rtol=1e-5, atol=1e-5)
    assert y3.shape == (2, 3)

    print("KERNEL_OK")
</pallas_src>

<mosaic_0001>
module attributes {stable_mosaic.version = 11 : i64} {
  func.func @_gap_kernel_single(%arg0: i32, %arg1: memref<8x256xf32, #tpu.memory_space<vmem>>, %arg2: memref<8x1xf32, #tpu.memory_space<vmem>>) attributes {dimension_semantics = [#tpu.dimension_semantics<parallel>], iteration_bounds = array<i64: 1>, scalar_prefetch = 0 : i64, scratch_operands = 0 : i64, tpu.core_type = #tpu.core_type<tc>, window_params = [{transform_indices = @transform_0, window_bounds = array<i64: 8, 256>}, {transform_indices = @transform_1, window_bounds = array<i64: 8, 1>}]} {
    %c0 = arith.constant 0 : index
    %c0_0 = arith.constant 0 : index
    %0 = vector.load %arg1[%c0, %c0_0] : memref<8x256xf32, #tpu.memory_space<vmem>>, vector<8x256xf32>
    %cst = arith.constant dense<0.000000e+00> : vector<8xf32>
    %1 = vector.multi_reduction <add>, %0, %cst [1] : vector<8x256xf32> to vector<8xf32>
    %2 = vector.shape_cast %1 : vector<8xf32> to vector<8x1xf32>
    %cst_1 = arith.constant 3.906250e-03 : f32
    %3 = vector.broadcast %cst_1 : f32 to vector<8x1xf32>
    %4 = arith.mulf %2, %3 : vector<8x1xf32>
    %c0_2 = arith.constant 0 : index
    %c0_3 = arith.constant 0 : index
    %5 = vector.load %arg2[%c0_2, %c0_3] : memref<8x1xf32, #tpu.memory_space<vmem>>, vector<8x1xf32>
    tpu.vector_store %arg2[%c0_2, %c0_3], %4 {strides = array<i32>} : memref<8x1xf32, #tpu.memory_space<vmem>>, vector<8x1xf32>,
    return
  }
  func.func @transform_0(%arg0: i32) -> (i32, i32) {
    %c0_i32 = arith.constant 0 : i32
    %c0_i32_0 = arith.constant 0 : i32
    return %arg0, %c0_i32 : i32, i32
  }
  func.func @transform_1(%arg0: i32) -> (i32, i32) {
    %c0_i32 = arith.constant 0 : i32
    %c0_i32_0 = arith.constant 0 : i32
    return %arg0, %c0_i32 : i32, i32
  }
}

</mosaic_0001>

<bundles_post_ra>
// kernel: tpu_custom_call.1
= control target key start
LH: loop header
LB: loop body
LE: loop exit
PB: predicated region body
PF: predicated region fallthrough
CT: control target
= control target key end

     0   :  { %6 = vsyncpa [#allocation3], 0  ;;  %s56_s6 = smov [#allocation2]   ;;  %s73_s0 = inlined_call_operand.hbm [shape: f32[8,256], index: 0, kind: input, shape index: {}]   ;;  %s74_s1 = inlined_call_operand.vmem [shape: f32[8,1], index: 1, kind: output, shape index: {}]  }
   0x1   :  { %s13_s7 = sshll.u32 %s56_s6, 4  ;;  %s14_s7 = int_to_ptr.vmem [resolvable:$true] %s13_s7 }
   0x2   :  { %s42_s8 = scalar_lea.vmem %s14_s7, 256  ;;  %p47_p1 = scmp.lt.s32.totalorder %s14_s7, %s14_s7 }
   0x3   :  { %p43_p0 = scmp.ne.s32.totalorder %s14_s7, %s42_s8  ;;  %p48_p2 = scmp.lt.s32.totalorder %s42_s8, %s42_s8 }
   0x5   :  { %p49_p3 = por %p48_p2, %p47_p1 }
   0x7   :  { %p50_p4 = pnand %p49_p3, %p43_p0 }
   0x9   :  { %53 = shalt.err (!%p50_p4)
}
   0xa   :  { %16 = dma.hbm_to_vmem [thread:$0]  %s73_s0, 256, %s14_s7, [#allocation3]  }
   0xb   :  { %54 = dma.done.wait [#allocation3], 256  }
   0xc   :  { %55 = vsyncadd [#allocation3], 4294967040  ;;  %v20_v0 = vld [vmem:[#allocation2] sm:$0xff]  ;;  %v21_v1 = vld [vmem:[#allocation2 + $0x8] sm:$0xff]  ;;  %vm26_vm0 = vcmask 7168  }
   0xd   :  { %v22_v2 = vadd.f32 %v21_v1, %v20_v0 }
   0xf   :  { %23 = vadd.xlane.f32.xlu0 %v22_v2 }
  0x98   :  { %v24_v3 = vpop.xlane.xlu0 %23 }
  0x99   :  { %v25_v4 = vmul.f32 0.00390625, %v24_v3 }
  0x9b   :  { %27 = vst.msk [vmem:[%s74_s1] sm:$0xff] %vm26_vm0, %v25_v4 }
  0x9c   :  { %32 = vsyncpa [#allocation3], 1 }

</bundles_post_ra>
